<compile_context>
chip_gen: v7x
topology: tpu7x:2x2x1
jax: 0.10.0
libtpu: 0.0.40
codegen_flags: <defaults>
</compile_context>

<pallas_src>
from functools import partial

import jax
import jax.numpy as jnp
from jax.experimental import pallas as pl
from jax.experimental.pallas import tpu as pltpu

OUT_PAD = 128  # layer-2 output lane width padded to one full lane tile (10 -> 128)


def _round_up(n, m):
    return ((n + m - 1) // m) * m


def mlp2_kernel(x_ref, w1_ref, b1_ref, w2_ref, b2_ref, o_ref):
    # In-kernel f32 -> bf16 cast of the x tile (hidden under the x DMA).
    x = x_ref[...].astype(jnp.bfloat16)
    # layer 1: Linear(784 -> H); bf16 operands, f32 accumulation on the MXU.
    h = jnp.dot(x, w1_ref[...], preferred_element_type=jnp.float32)
    h = h + b1_ref[...]                                  # (TB, H) + (1, H), f32
    # exact sigmoid: kernel is DMA-bound, the exact divide costs nothing.
    h = 1.0 / (1.0 + jnp.exp(-h))
    # layer 2: Linear(H -> 128 padded); out_activate=False -> no activation.
    o = jnp.dot(h.astype(w2_ref.dtype), w2_ref[...],
                preferred_element_type=jnp.float32)
    o_ref[...] = (o + b2_ref[...]).astype(o_ref.dtype)   # bf16 lane-dense store


def prepare_params(w1_t, b1, w2_t, b2):
    """One-time parameter prep (keep OFF the per-call path):
    zero-pad layer-2 N from 10 to 128 (lane-dense writeback) and cast the
    matmul weights to bf16.  Biases stay f32."""
    H, out_dim = w2_t.shape
    w2_pad = jnp.zeros((H, OUT_PAD), jnp.float32).at[:, :out_dim].set(w2_t)
    b2_pad = jnp.zeros((1, OUT_PAD), jnp.float32).at[:, :out_dim].set(b2)
    return (w1_t.astype(jnp.bfloat16),
            b1.astype(jnp.float32),
            w2_pad.astype(jnp.bfloat16),
            b2_pad.astype(jnp.float32))


def _pick_batch_tile(B, batch_tile):
    """Batch tile: multiple of 8 sublanes (f32 x), clamped to the batch, and
    split so there are >=2 grid steps whenever possible (v7x megacore)."""
    tb = min(_round_up(max(batch_tile, 8), 8), _round_up(B, 8))
    if B >= 16 and pl.cdiv(B, tb) < 2:
        tb = _round_up(pl.cdiv(B, 2), 8)
    return tb


@partial(jax.jit, static_argnames=("out_dim", "batch_tile"))
def net2layers_forward(x, w1_bf, b1, w2_bf, b2_pad, *, out_dim=10,
                       batch_tile=1024):
    """x: (B, 784) f32; prepared params from prepare_params()."""
    B, in_dim = x.shape
    H = w1_bf.shape[1]
    tb = _pick_batch_tile(B, batch_tile)
    grid = (pl.cdiv(B, tb),)          # ragged last block handled by Pallas

    out = pl.pallas_call(
        mlp2_kernel,
        out_shape=jax.ShapeDtypeStruct((B, OUT_PAD), jnp.bfloat16),
        grid=grid,
        in_specs=[
            pl.BlockSpec((tb, in_dim), lambda i: (i, 0)),    # x: batch-tiled (dominant DMA)
            pl.BlockSpec((in_dim, H), lambda i: (0, 0)),     # w1: resident (DMA'd once)
            pl.BlockSpec((1, H), lambda i: (0, 0)),          # b1: resident
            pl.BlockSpec((H, OUT_PAD), lambda i: (0, 0)),    # w2: resident
            pl.BlockSpec((1, OUT_PAD), lambda i: (0, 0)),    # b2: resident
        ],
        out_specs=pl.BlockSpec((tb, OUT_PAD), lambda i: (i, 0)),
        compiler_params=pltpu.CompilerParams(
            dimension_semantics=("parallel",)),
    )(x, w1_bf, b1, w2_bf, b2_pad)

    # Column slice + f32 upcast of the 10 real logits; fused by XLA under this
    # jit (reads only 128 lanes/row of bf16, writes 10 f32/row).
    return out[:, :out_dim].astype(jnp.float32)


def init_params(key, hidden_size, activation="sigmoid"):
    """Deterministic init matching the module: xavier_uniform weights, zero bias."""
    in_size, out_size = 28 * 28, 10
    k1, k2 = jax.random.split(key)

    def xavier_uniform(k, fan_out, fan_in):
        # PyTorch xavier_uniform_ on weight of shape (fan_out, fan_in), gain=1.0
        limit = (6.0 / (fan_in + fan_out)) ** 0.5
        return jax.random.uniform(k, (fan_out, fan_in), jnp.float32, -limit, limit)

    # TODO(synk): kaiming_uniform_ branch for activation == 'relu' not exercised here.
    w1 = xavier_uniform(k1, hidden_size, in_size)   # (H, 784) PyTorch layout
    w2 = xavier_uniform(k2, out_size, hidden_size)  # (10, H)
    b1 = jnp.zeros((1, hidden_size), jnp.float32)
    b2 = jnp.zeros((1, out_size), jnp.float32)
    # Pre-transpose to kernel layout [in, out]
    return w1.T, b1, w2.T, b2


def reference_forward(x, w1_t, b1, w2_t, b2):
    h = jax.nn.sigmoid(x @ w1_t + b1)
    return h @ w2_t + b2


if __name__ == "__main__":
    key = jax.random.PRNGKey(0)
    kx, kp, kx2 = jax.random.split(key, 3)

    batch, hidden = 16, 32
    x = jax.random.normal(kx, (batch, 28 * 28), jnp.float32)
    w1_t, b1, w2_t, b2 = init_params(kp, hidden, activation="sigmoid")
    params = prepare_params(w1_t, b1, w2_t, b2)   # one-time pad + bf16 cast

    # Test 1: default tile -> tile-split path (tb=8, grid=(2,), both TCs on v7x).
    out = net2layers_forward(x, *params)
    out = jax.block_until_ready(out)
    ref = reference_forward(x, w1_t, b1, w2_t, b2)
    assert out.shape == (batch, 10)
    # bf16 matmul operands + bf16 writeback -> relaxed tolerance vs f32 ref
    assert jnp.allclose(out, ref, atol=3e-2, rtol=3e-2), "mismatch vs reference"

    # Test 2: multi-step grid with a ragged (masked) last block: 40 = 16+16+8.
    batch2 = 40
    x2 = jax.random.normal(kx2, (batch2, 28 * 28), jnp.float32)
    out2 = net2layers_forward(x2, *params, batch_tile=16)   # grid=(3,)
    out2 = jax.block_until_ready(out2)
    ref2 = reference_forward(x2, w1_t, b1, w2_t, b2)
    assert out2.shape == (batch2, 10)
    assert jnp.allclose(out2, ref2, atol=3e-2, rtol=3e-2), "mismatch vs reference (tiled)"

    print("KERNEL_OK")
</pallas_src>

<mosaic_0001>
module attributes {stable_mosaic.version = 11 : i64} {
  func.func @mlp2_kernel(%arg0: i32, %arg1: memref<8x784xf32, #tpu.memory_space<vmem>>, %arg2: memref<784x32xbf16, #tpu.memory_space<vmem>>, %arg3: memref<1x32xf32, #tpu.memory_space<vmem>>, %arg4: memref<32x128xbf16, #tpu.memory_space<vmem>>, %arg5: memref<1x128xf32, #tpu.memory_space<vmem>>, %arg6: memref<8x128xbf16, #tpu.memory_space<vmem>>) attributes {dimension_semantics = [#tpu.dimension_semantics<parallel>], iteration_bounds = array<i64: 2>, scalar_prefetch = 0 : i64, scratch_operands = 0 : i64, tpu.core_type = #tpu.core_type<tc>, window_params = [{transform_indices = @transform_0, window_bounds = array<i64: 8, 784>}, {pipeline_mode = #tpu.pipeline_mode<synchronous>, transform_indices = @transform_1, window_bounds = array<i64: 784, 32>}, {pipeline_mode = #tpu.pipeline_mode<synchronous>, transform_indices = @transform_2, window_bounds = array<i64: 1, 32>}, {pipeline_mode = #tpu.pipeline_mode<synchronous>, transform_indices = @transform_3, window_bounds = array<i64: 32, 128>}, {pipeline_mode = #tpu.pipeline_mode<synchronous>, transform_indices = @transform_4, window_bounds = array<i64: 1, 128>}, {transform_indices = @transform_5, window_bounds = array<i64: 8, 128>}]} {
    %c0 = arith.constant 0 : index
    %c0_0 = arith.constant 0 : index
    %0 = vector.load %arg1[%c0, %c0_0] : memref<8x784xf32, #tpu.memory_space<vmem>>, vector<8x784xf32>
    %1 = arith.truncf %0 : vector<8x784xf32> to vector<8x784xbf16>
    %c0_1 = arith.constant 0 : index
    %c0_2 = arith.constant 0 : index
    %2 = vector.load %arg2[%c0_1, %c0_2] : memref<784x32xbf16, #tpu.memory_space<vmem>>, vector<784x32xbf16>
    %cst = arith.constant dense<0.000000e+00> : vector<8x32xf32>
    %3 = tpu.matmul %1, %2, %cst {dimension_numbers = #tpu.dot_dimension_numbers<[1], [0], [0], [1], [0, 0, 1, 1], [], []>} : vector<8x784xbf16>, vector<784x32xbf16>, vector<8x32xf32> -> vector<8x32xf32>
    %c0_3 = arith.constant 0 : index
    %c0_4 = arith.constant 0 : index
    %4 = vector.load %arg3[%c0_3, %c0_4] : memref<1x32xf32, #tpu.memory_space<vmem>>, vector<1x32xf32>
    %5 = vector.broadcast %4 : vector<1x32xf32> to vector<8x32xf32>
    %6 = arith.addf %3, %5 : vector<8x32xf32>
    %cst_5 = arith.constant 0.000000e+00 : f32
    %7 = vector.broadcast %cst_5 : f32 to vector<8x32xf32>
    %8 = arith.subf %7, %6 : vector<8x32xf32>
    %9 = math.exp %8 : vector<8x32xf32>
    %cst_6 = arith.constant 1.000000e+00 : f32
    %10 = vector.broadcast %cst_6 : f32 to vector<8x32xf32>
    %11 = arith.addf %10, %9 : vector<8x32xf32>
    %cst_7 = arith.constant 1.000000e+00 : f32
    %12 = vector.broadcast %cst_7 : f32 to vector<8x32xf32>
    %13 = arith.divf %12, %11 : vector<8x32xf32>
    %14 = arith.truncf %13 : vector<8x32xf32> to vector<8x32xbf16>
    %c0_8 = arith.constant 0 : index
    %c0_9 = arith.constant 0 : index
    %15 = vector.load %arg4[%c0_8, %c0_9] : memref<32x128xbf16, #tpu.memory_space<vmem>>, vector<32x128xbf16>
    %cst_10 = arith.constant dense<0.000000e+00> : vector<8x128xf32>
    %16 = tpu.matmul %14, %15, %cst_10 {dimension_numbers = #tpu.dot_dimension_numbers<[1], [0], [0], [1], [0, 0, 1, 1], [], []>} : vector<8x32xbf16>, vector<32x128xbf16>, vector<8x128xf32> -> vector<8x128xf32>
    %c0_11 = arith.constant 0 : index
    %c0_12 = arith.constant 0 : index
    %17 = vector.load %arg5[%c0_11, %c0_12] : memref<1x128xf32, #tpu.memory_space<vmem>>, vector<1x128xf32>
    %18 = vector.broadcast %17 : vector<1x128xf32> to vector<8x128xf32>
    %19 = arith.addf %16, %18 : vector<8x128xf32>
    %20 = arith.truncf %19 : vector<8x128xf32> to vector<8x128xbf16>
    %c0_13 = arith.constant 0 : index
    %c0_14 = arith.constant 0 : index
    %21 = vector.load %arg6[%c0_13, %c0_14] : memref<8x128xbf16, #tpu.memory_space<vmem>>, vector<8x128xbf16>
    tpu.vector_store %arg6[%c0_13, %c0_14], %20 {strides = array<i32>} : memref<8x128xbf16, #tpu.memory_space<vmem>>, vector<8x128xbf16>,
    return
  }
  func.func @transform_0(%arg0: i32) -> (i32, i32) {
    %c0_i32 = arith.constant 0 : i32
    %c0_i32_0 = arith.constant 0 : i32
    return %arg0, %c0_i32 : i32, i32
  }
  func.func @transform_1(%arg0: i32) -> (i32, i32) {
    %c0_i32 = arith.constant 0 : i32
    %c0_i32_0 = arith.constant 0 : i32
    %c0_i32_1 = arith.constant 0 : i32
    return %c0_i32, %c0_i32_0 : i32, i32
  }
  func.func @transform_2(%arg0: i32) -> (i32, i32) {
    %c0_i32 = arith.constant 0 : i32
    %c0_i32_0 = arith.constant 0 : i32
    %c0_i32_1 = arith.constant 0 : i32
    return %c0_i32, %c0_i32_0 : i32, i32
  }
  func.func @transform_3(%arg0: i32) -> (i32, i32) {
    %c0_i32 = arith.constant 0 : i32
    %c0_i32_0 = arith.constant 0 : i32
    %c0_i32_1 = arith.constant 0 : i32
    return %c0_i32, %c0_i32_0 : i32, i32
  }
  func.func @transform_4(%arg0: i32) -> (i32, i32) {
    %c0_i32 = arith.constant 0 : i32
    %c0_i32_0 = arith.constant 0 : i32
    %c0_i32_1 = arith.constant 0 : i32
    return %c0_i32, %c0_i32_0 : i32, i32
  }
  func.func @transform_5(%arg0: i32) -> (i32, i32) {
    %c0_i32 = arith.constant 0 : i32
    %c0_i32_0 = arith.constant 0 : i32
    return %arg0, %c0_i32 : i32, i32
  }
}

</mosaic_0001>

<bundles_post_ra>
// kernel: net2layers_forward.1
= control target key start
LH: loop header
LB: loop body
LE: loop exit
PB: predicated region body
PF: predicated region fallthrough
CT: control target
= control target key end

     0   :  { %s1185_s18 = smov 0   ;;  %s1380_s0 = inlined_call_operand.vmem [shape: f32[16,784], index: 0, kind: input, shape index: {}]   ;;  %s1381_s1 = inlined_call_operand.vmem [shape: bf16[784,32], index: 1, kind: input, shape index: {}]   ;;  %s1382_s2 = inlined_call_operand.vmem [shape: f32[1,32], index: 2, kind: input, shape index: {}]   ;;  %s1383_s3 = inlined_call_operand.vmem [shape: bf16[32,128], index: 3, kind: input, shape index: {}]   ;;  %s1384_s4 = inlined_call_operand.vmem [shape: f32[1,128], index: 4, kind: input, shape index: {}]   ;;  %s1385_s5 = inlined_call_operand.vmem [shape: bf16[16,128], index: 5, kind: output, shape index: {}]  }
   0x1 LB: > { %s930_s19 = sadd.s32 4294967295, %s1151_s18   ;;  %p934_p0 = scmp.ge.s32.totalorder %s1151_s18, 1  ;;  %s1151_s18 = sphi %s1185_s18, %s15_s18  }
   0x2   : > { %p187_p1 = scmp.lt.s32.totalorder %s1151_s18, 3 }
   0x4   : > { %p188_p2 = pnand %p934_p0, %p187_p1 }
   0x5   : > { %v1090_v0 = vld [vmem:[%s1381_s1 + $0x40] sm:$0xff] (!%p188_p2)   ;;  %v1094_v4 = vld [vmem:[%s1381_s1 + $0x48] sm:$0xff] (!%p188_p2)   ;;  %v1098_v8 = vld [vmem:[%s1381_s1 + $0x50] sm:$0xff] (!%p188_p2)   ;;  %p214_p3 = scmp.lt.s32.totalorder (!%p188_p2), %s930_s19, 1  ;;  %v1153_v44 = vmov (!%p188_p2), 0.0   ;;  %vm1154_vm0 = vmmov (!%p188_p2), 0  }
   0x6   : > { %191 = sbr.rel (%p188_p2) target bundleno = 536 (0x218), region = 40  ;;  %v1091_v1 = vld [vmem:[%s1381_s1] sm:$0xff] (!%p188_p2)   ;;  %994 = vmatprep.subr.bf16.mxu0 (!%p188_p2), %v1090_v0  ;;  %v1095_v5 = vld [vmem:[%s1381_s1 + $0x8] sm:$0xff] (!%p188_p2)   ;;  %v1099_v9 = vld [vmem:[%s1381_s1 + $0x10] sm:$0xff] (!%p188_p2)   ;;  %vm637_vm1 = vcmask (!%p188_p2), 130048   ;;  %vm831_vm2 = vcmask (!%p188_p2), 261120  }
   0x7   : > { %v1092_v2 = vld [vmem:[%s1381_s1 + $0xc0] sm:$0xff] (!%p188_p2)   ;;  %995 = vmatpush3.bf16.msra.mxu0 (!%p188_p2), %v1091_v1  ;;  %v1096_v6 = vld [vmem:[%s1381_s1 + $0xc8] sm:$0xff] (!%p188_p2)   ;;  %v1100_v10 = vld [vmem:[%s1381_s1 + $0xd0] sm:$0xff] (!%p188_p2)  }
   0x8   : > { %v1093_v3 = vld [vmem:[%s1381_s1 + $0x80] sm:$0xff] (!%p188_p2)   ;;  %1016 = vmatprep.subr.bf16.mxu1 (!%p188_p2), %v1092_v2  ;;  %996 = vmatprep.subr.bf16.mxu0 (!%p188_p2), %v1094_v4  ;;  %v1097_v7 = vld [vmem:[%s1381_s1 + $0x88] sm:$0xff] (!%p188_p2)   ;;  %v1101_v11 = vld [vmem:[%s1381_s1 + $0x90] sm:$0xff] (!%p188_p2)  }
   0x9   : > { %1017 = vmatpush3.bf16.msra.mxu1 (!%p188_p2), %v1093_v3  ;;  %v1102_v12 = vld [vmem:[%s1381_s1 + $0x58] sm:$0xff] (!%p188_p2)   ;;  %v1106_v16 = vld [vmem:[%s1381_s1 + $0x60] sm:$0xff] (!%p188_p2)   ;;  %v1110_v20 = vld [vmem:[%s1381_s1 + $0x68] sm:$0xff] (!%p188_p2)  }
   0xa   : > { %1018 = vmatprep.subr.bf16.mxu1 (!%p188_p2), %v1096_v6  ;;  %v1103_v13 = vld [vmem:[%s1381_s1 + $0x18] sm:$0xff] (!%p188_p2)   ;;  %v1107_v17 = vld [vmem:[%s1381_s1 + $0x20] sm:$0xff] (!%p188_p2)   ;;  %v1111_v21 = vld [vmem:[%s1381_s1 + $0x28] sm:$0xff] (!%p188_p2)  }
   0xb   : > { %997 = vmatpush3.bf16.msra.mxu0 (!%p188_p2), %v1095_v5  ;;  %v1104_v14 = vld [vmem:[%s1381_s1 + $0xd8] sm:$0xff] (!%p188_p2)   ;;  %v1108_v18 = vld [vmem:[%s1381_s1 + $0xe0] sm:$0xff] (!%p188_p2)   ;;  %v1112_v22 = vld [vmem:[%s1381_s1 + $0xe8] sm:$0xff] (!%p188_p2)  }
   0xc   : > { %998 = vmatprep.subr.bf16.mxu0 (!%p188_p2), %v1098_v8  ;;  %v1105_v15 = vld [vmem:[%s1381_s1 + $0x98] sm:$0xff] (!%p188_p2)   ;;  %v1109_v19 = vld [vmem:[%s1381_s1 + $0xa0] sm:$0xff] (!%p188_p2)   ;;  %v1113_v23 = vld [vmem:[%s1381_s1 + $0xa8] sm:$0xff] (!%p188_p2)  }
   0xd   : > { %1019 = vmatpush3.bf16.msra.mxu1 %v1097_v7  ;;  %s1387_s19 = smov (!%p214_p3, %s930_s19), 1  ;;  %v1114_v24 = vld [vmem:[%s1381_s1 + $0x70] sm:$0xff]   ;;  %v1118_v28 = vld [vmem:[%s1381_s1 + $0x78] sm:$0xff]   ;;  %v1122_v36 = vld [vmem:[%s1381_s1 + $0x140] sm:$0xff]  }
   0xe   : > { %1020 = vmatprep.subr.bf16.mxu1 %v1100_v10  ;;  %s1079_s24 = smul.u32 56, %s1387_s19  ;;  %v1115_v25 = vld [vmem:[%s1381_s1 + $0x30] sm:$0xff]   ;;  %v1119_v29 = vld [vmem:[%s1381_s1 + $0x38] sm:$0xff]   ;;  %v1123_v39 = vld [vmem:[%s1381_s1 + $0x100] sm:$0xff]   ;;  %s936_s14 = sshll.u32 %s1387_s19, 2 }
   0xf   : > { %999 = vmatpush3.bf16.msra.mxu0 %v1099_v9  ;;  %v1116_v26 = vld [vmem:[%s1381_s1 + $0xf0] sm:$0xff]   ;;  %v1120_v30 = vld [vmem:[%s1381_s1 + $0xf8] sm:$0xff]   ;;  %v1124_v42 = vld [vmem:[%s1381_s1 + $0x148] sm:$0xff]   ;;  %s222_s17 = scalar_lea.vmem %s1385_s5, %s936_s14 }
  0x10   : > { %1000 = vmatprep.subr.bf16.mxu0 %v1102_v12  ;;  %v1117_v27 = vld [vmem:[%s1381_s1 + $0xb0] sm:$0xff]   ;;  %s1290_s10 = scalar_lea.vmem %s1380_s0, %s1079_s24  ;;  %v1121_v33 = vld [vmem:[%s1381_s1 + $0xb8] sm:$0xff]   ;;  %v1125_v43 = vld [vmem:[%s1381_s1 + $0x108] sm:$0xff]  }
  0x11   : > { %1021 = vmatpush3.bf16.msra.mxu1 %v1101_v11  ;;  %v225_v31 = vld [vmem:[%s1290_s10 + $0x8] sm:$0xff]  ;;  %v224_v34 = vld [vmem:[%s1290_s10] sm:$0xff]  ;;  %v227_v37 = vld [vmem:[%s1290_s10 + $0x18] sm:$0xff] }
  0x12   : > { %1022 = vmatprep.subr.bf16.mxu1 %v1104_v14  ;;  %v232_v32 = vpack.c.bf16 %v225_v31, %v225_v31  ;;  %v231_v35 = vpack.c.bf16 %v224_v34, %v224_v34  ;;  %v234_v38 = vpack.c.bf16 %v227_v37, %v227_v37  ;;  %v226_v40 = vld [vmem:[%s1290_s10 + $0x10] sm:$0xff]  ;;  %v1128_v47 = vld [vmem:[%s1381_s1 + $0x158] sm:$0xff]   ;;  %v1130_v49 = vld [vmem:[%s1381_s1 + $0x160] sm:$0xff]  }
  0x13   : > { %1001 = vmatpush3.bf16.msra.mxu0 %v1103_v13  ;;  %v233_v41 = vpack.c.bf16 %v226_v40, %v226_v40  ;;  %v1126_v45 = vld [vmem:[%s1381_s1 + $0x150] sm:$0xff]   ;;  %v1129_v48 = vld [vmem:[%s1381_s1 + $0x118] sm:$0xff]   ;;  %v1131_v50 = vld [vmem:[%s1381_s1 + $0x120] sm:$0xff]  }
  0x14   : > { %1002 = vmatprep.subr.bf16.mxu0 %v1106_v16  ;;  %673 = vmatprep.mubr.bf16.mxu0 %v232_v32  ;;  %v1127_v46 = vld [vmem:[%s1381_s1 + $0x110] sm:$0xff]   ;;  %v1132_v51 = vld [vmem:[%s1381_s1 + $0x168] sm:$0xff]   ;;  %v1138_v52 = vld [vmem:[%s1381_s1 + $0x180] sm:$0xff]  }
  0x15   : > { %1023 = vmatpush3.bf16.msra.mxu1 %v1105_v15  ;;  %713 = vmatprep.mubr.bf16.mxu1 %v234_v38  ;;  %v229_v53 = vld [vmem:[%s1290_s10 + $0x28] sm:$0xff]  ;;  %v230_v55 = vld [vmem:[%s1290_s10 + $0x30] sm:$0xff]  ;;  %v1136_v60 = vld [vmem:[%s1381_s1 + $0x178] sm:$0xff]  }
  0x16   : > { %1024 = vmatprep.subr.bf16.mxu1 %v1108_v18  ;;  %v236_v54 = vpack.c.bf16 %v229_v53, %v229_v53  ;;  %v1133_v56 = vld [vmem:[%s1381_s1 + $0x128] sm:$0xff]   ;;  %v237_v57 = vpack.c.bf16 %v230_v55, %v230_v55  ;;  %v1134_v58 = vld [vmem:[%s1381_s1 + $0x170] sm:$0xff]   ;;  %v1137_v61 = vld [vmem:[%s1381_s1 + $0x138] sm:$0xff]  }
  0x17   : > { %1003 = vmatpush3.bf16.msra.mxu0 %v1107_v17  ;;  %v1135_v59 = vld [vmem:[%s1381_s1 + $0x130] sm:$0xff]   ;;  %v228_v62 = vld [vmem:[%s1290_s10 + $0x20] sm:$0xff]  ;;  %v1140_v1 = vld [vmem:[%s1383_s3 + $0x8] sm:$0xff]  }
  0x18   : > { %1004 = vmatprep.subr.bf16.mxu0 %v1110_v20  ;;  %v235_v63 = vpack.c.bf16 %v228_v62, %v228_v62  ;;  %v1139_v0 = vld [vmem:[%s1383_s3] sm:$0xff]  }
  0x19   : > { %1025 = vmatpush3.bf16.msra.mxu1 %v1109_v19  ;;  %v937_v3 = vld [vmem:[%s1382_s2] ss:$0 sm:$0xff] }
  0x1a   : > { %1026 = vmatprep.subr.bf16.mxu1 %v1112_v22  ;;  %v988_v32 = vld [vmem:[%s1384_s4] ss:$0 sm:$0xff] }
  0x1b   : > { %1005 = vmatpush3.bf16.msra.mxu0 %v1111_v21 }
  0x1c   : > { %1006 = vmatprep.subr.bf16.mxu0 %v1114_v24 }
  0x1d   : > { %1027 = vmatpush3.bf16.msra.mxu1 %v1113_v23 }
  0x1e   : > { %1028 = vmatprep.subr.bf16.mxu1 %v1116_v26 }
  0x1f   : > { %1007 = vmatpush3.bf16.msra.mxu0 %v1115_v25 }
  0x20   : > { %1008 = vmatprep.subr.bf16.mxu0 %v1118_v28 }
  0x21   : > { %1029 = vmatpush3.bf16.msra.mxu1 %v1117_v27 }
  0x22   : > { %1030 = vmatprep.subr.bf16.mxu1 %v1120_v30 }
  0x23   : > { %1009 = vmatpush3.bf16.msra.mxu0 %v1119_v29 }
  0x24   : > { %1038 = vmatprep.subr.bf16.mxu0 %v1122_v36 }
  0x25   : > { %1031 = vmatpush3.bf16.msra.mxu1 %v1121_v33 }
  0x26   : > { %674 = vmatmul.mubr.bf16.vlgmr.msra.gmra.mrb[0].mxu0 %v231_v35  ;;  %1065 = vmatprep.subr.bf16.mxu1 %v1153_v44 }
  0x27   : > { %1039 = vmatpush3.bf16.msra.mxu0 %v1123_v39  ;;  %753 = vmatprep.mubr.bf16.mxu0 %v236_v54 }
  0x28   : > { %714 = vmatmul.mubr.bf16.vlgmr.msra.gmra.mrb[0].mxu1 %v233_v41  ;;  %1040 = vmatprep.subr.bf16.mxu0 %v1124_v42 }
  0x29   : > { %1067 = vmatprep.mubr.msk.bf16.mxu1 %vm1154_vm0, %v1153_v44  ;;  %1066 = vmatpush3.bf16.msra.mxu1 %v1138_v52 }
  0x2a   : > { %1071 = vmatprep.subr.bf16.mxu1 %v1153_v44 }
  0x2b   : > { %1041 = vmatpush3.bf16.msra.mxu0 %v1125_v43 }
  0x2c   : > { %1042 = vmatprep.subr.bf16.mxu0 %v1126_v45 }
  0x2f   : > { %1043 = vmatpush3.bf16.msra.mxu0 %v1127_v46 }
  0x30   : > { %1044 = vmatprep.subr.bf16.mxu0 %v1128_v47  ;;  %1068 = vmatmul.mubr.msk.bf16.vlgmr.msra.gmra.mrb[4].mxu1 %vm637_vm1, %v237_v57 }
  0x31   : > { %1075 = vmatprep.mubr.msk.bf16.mxu1 %vm1154_vm0, %v1153_v44  ;;  %1072 = vmatpush3.bf16.msra.mxu1 %v1139_v0 }
  0x32   : > { %1073 = vmatprep.subr.bf16.mxu1 %v1153_v44 }
  0x33   : > { %1045 = vmatpush3.bf16.msra.mxu0 %v1129_v48 }
  0x34   : > { %1046 = vmatprep.subr.bf16.mxu0 %v1130_v49 }
  0x35   : > { %1074 = vmatpush3.bf16.msra.mxu1 %v1140_v1 }
  0x37   : > { %1047 = vmatpush3.bf16.msra.mxu0 %v1131_v50 }
  0x38   : > { %1048 = vmatprep.subr.bf16.mxu0 %v1132_v51 }
  0x3b   : > { %1049 = vmatpush3.bf16.msra.mxu0 %v1133_v56 }
  0x3c   : > { %1050 = vmatprep.subr.bf16.mxu0 %v1134_v58 }
  0x3f   : > { %1051 = vmatpush3.bf16.msra.mxu0 %v1135_v59 }
  0x40   : > { %1052 = vmatprep.subr.bf16.mxu0 %v1136_v60 }
  0x43   : > { %1053 = vmatpush3.bf16.msra.mxu0 %v1137_v61 }
  0x46   : > { %754 = vmatmul.mubr.bf16.vlgmr.msra.gmra.mrb[4].mxu0 %v235_v63 }
  0xf9   : > { %v1010_v2 = vpop.f32.mrb[0].mxu0 }
  0xfa   : > { %v1011_v4 = vpop.f32.mrb[1].mxu0 }
  0xfb   : > { %v1012_v5 = vadd.f32 %v1011_v4, %v1010_v2  ;;  %v1013_v6 = vpop.f32.mrb[2].mxu0  ;;  %v1032_v7 = vpop.f32.mrb[0].mxu1 }
  0xfc   : > { %v1014_v8 = vpop.f32.mrb[3].mxu0  ;;  %v1033_v10 = vpop.f32.mrb[1].mxu1 }
  0xfd   : > { %v676_v9 = vadd.f32 %v1012_v5, %v937_v3  ;;  %v1034_v11 = vadd.f32 %v1033_v10, %v1032_v7  ;;  %v1035_v12 = vpop.f32.mrb[2].mxu1 }
  0xfe   : > { %v1036_v13 = vpop.f32.mrb[3].mxu1 }
  0xff   : > { %v716_v14 = vadd.f32 %v1034_v11, %v676_v9 }
 0x103   : > { %v795_v15 = vpop.f32.mrb[4].mxu1 }
 0x104   : > { %v1069_v16 = vpop.f32.mrb[5].mxu1 }
 0x105   : > { %v798_v17 = vpop.f32.mrb[6].mxu1 }
 0x106   : > { %v1070_v18 = vpop.f32.mrb[7].mxu1 }
 0x119   : > { %v1054_v19 = vpop.f32.mrb[4].mxu0 }
 0x11a   : > { %v1055_v20 = vpop.f32.mrb[5].mxu0 }
 0x11b   : > { %v1056_v21 = vadd.f32 %v1055_v20, %v1054_v19  ;;  %v1057_v22 = vpop.f32.mrb[6].mxu0 }
 0x11c   : > { %v1058_v23 = vpop.f32.mrb[7].mxu0 }
 0x11d   : > { %v756_v24 = vadd.f32 %v1056_v21, %v716_v14 }
 0x11f   : > { %v796_v25 = vadd.f32 %v795_v15, %v756_v24 }
 0x121   : > { %v801_v26 = vsub.f32 0.0, %v796_v25 }
 0x123   : > { %v802_v27 = vmul.f32 1.442695, %v801_v26 }
 0x125   : > { %1141 = vpow2.f32 %v802_v27 }
 0x12f   : > { %v1142_v28 = vpop.eup %1141 }
 0x130   : > { %v804_v29 = vadd.f32 1.0, %v1142_v28 }
 0x132   : > { %1143 = vrcp.f32 %v804_v29 }
 0x13c   : > { %v1144_v30 = vpop.eup %1143 }
 0x13d   : > { %v807_v31 = vpack.c.bf16 %v1144_v30, %v1144_v30 }
 0x13f   : > { %1076 = vmatmul.mubr.msk.bf16.vlgmr.msra.gmra.mrb[8].mxu1 %vm831_vm2, %v807_v31 }
 0x212   : > { %v869_v33 = vpop.f32.mrb[8].mxu1 }
 0x213   : > { %v870_v34 = vadd.f32 %v988_v32, %v869_v33  ;;  %v1077_v35 = vpop.f32.mrb[9].mxu1 }
 0x214   : > { %v872_v36 = vpop.f32.mrb[10].mxu1 }
 0x215   : > { %v875_v37 = vpack.c.bf16 %v870_v34, %v870_v34  ;;  %v1078_v38 = vpop.f32.mrb[11].mxu1 }
 0x217   : > { %876 = vst [vmem:[%s222_s17] sm:$0xf] %v875_v37 }
 0x218 PF: > { %s15_s18 = sadd.s32 1, %s1151_s18  }
 0x219   : > { %p12_p4 = scmp.ge.s32.totalorder %s15_s18, 4  }
 0x21b   :  { %14 = sbr.rel (!%p12_p4) target bundleno = 1 (0x1), region = 70 }

</bundles_post_ra>
